<compile_context>
chip_gen: v7x
topology: tpu7x:2x2x1
jax: 0.10.0
libtpu: 0.0.40
codegen_flags: <defaults>
</compile_context>

<pallas_src>
import jax
import jax.numpy as jnp
from jax.experimental import pallas as pl
from jax.experimental.pallas import tpu as pltpu

# Deterministic "config" values (stand-in for config.json in the PyTorch code).
ALPHA = 0.5
EXTREMA_WEIGHT = 2.0
ES_SENTINEL = -0.2   # labels == -0.2 mask (exact f32 compare, like PyTorch)
ED_SENTINEL = 1.2    # labels ==  1.2 mask


def _make_combine_loss_kernel(*, alpha, extrema_weight, B, T, tile_rows,
                              needs_row_mask):
    # Plain Python floats only -> become jaxpr literals, never captured consts.
    inv_n = 1.0 / float(B * T)
    inv_nd = 1.0 / float(B * (T - 1))
    w_mse = (1.0 - float(alpha)) * inv_n            # weight on (p-l)^2 everywhere
    w_ext = float(extrema_weight) * inv_n           # extra weight on sentinel labels
    w_mono = float(alpha) * inv_nd                  # weight on monotonicity hinge

    def kernel(preds_ref, labels_ref, out_ref):
        p = preds_ref[...].astype(jnp.float32)      # (tile_rows, T)
        l = labels_ref[...].astype(jnp.float32)

        d = p - l
        d2 = d * d

        # (p*mask - l*mask)^2 == mask * d^2 for a 0/1 mask, so the extrema
        # losses just add ew/N to the per-element squared-error weight.
        ext_w = (jnp.where(l == ES_SENTINEL, w_ext, 0.0)
                 + jnp.where(l == ED_SENTINEL, w_ext, 0.0))
        term = (w_mse + ext_w) * d2

        # Monotonicity term: roll(x, T-1) == roll(x, -1) puts x[:, i+1] at
        # column i (XLU rotation, stays full (8,128) tiles); the wrapped last
        # column is zeroed with a lane-iota mask.
        dl = pltpu.roll(l, T - 1, axis=1) - l
        dp = pltpu.roll(p, T - 1, axis=1) - p
        mono = (jnp.where(dl > 0, jnp.maximum(-dp, 0.0), 0.0)
                + jnp.where(dl < 0, jnp.maximum(dp, 0.0), 0.0))
        lane = jax.lax.broadcasted_iota(jnp.int32, (tile_rows, T), 1)
        mono = jnp.where(lane < T - 1, mono, 0.0)
        term = term + w_mono * mono

        if needs_row_mask:
            # Ragged last batch tile: zero rows past the true batch size so
            # padded data never contaminates the mean.
            row = (pl.program_id(0) * tile_rows
                   + jax.lax.broadcasted_iota(jnp.int32, (tile_rows, T), 0))
            term = jnp.where(row < B, term, 0.0)

        partial = jnp.sum(term)                     # single fused reduction
        out_ref[...] = jnp.broadcast_to(partial, (1, 8, 128))

    return kernel


def _pick_tile_rows(B, T, target_bytes=2 << 20):
    """Rows per block so one f32 input block is ~2 MiB (safe on v5e/v6e/v7x)."""
    rows = (target_bytes // (4 * T)) // 8 * 8
    rows = max(8, int(rows))
    if rows >= B:
        return B                                    # full extent: always legal
    return rows


def combine_loss(preds, labels, alpha=ALPHA, extrema_weight=EXTREMA_WEIGHT,
                 tile_rows=None):
    assert preds.shape == labels.shape and preds.ndim == 2
    B, T = preds.shape
    assert T >= 2, "need at least 2 time steps for the monotonicity loss"

    tb = _pick_tile_rows(B, T) if tile_rows is None else int(tile_rows)
    num_blocks = pl.cdiv(B, tb)
    kernel = _make_combine_loss_kernel(
        alpha=alpha, extrema_weight=extrema_weight, B=B, T=T, tile_rows=tb,
        needs_row_mask=(B % tb != 0))

    partials = pl.pallas_call(
        kernel,
        out_shape=jax.ShapeDtypeStruct((num_blocks, 8, 128), jnp.float32),
        grid=(num_blocks,),
        in_specs=[
            pl.BlockSpec((tb, T), lambda i: (i, 0)),
            pl.BlockSpec((tb, T), lambda i: (i, 0)),
        ],
        out_specs=pl.BlockSpec((1, 8, 128), lambda i: (i, 0, 0)),
        compiler_params=pltpu.CompilerParams(
            dimension_semantics=("parallel",),      # megacore-shardable on v7x
            vmem_limit_bytes=64 << 20,
        ),
    )(preds, labels)

    # Final scalar combine in plain JAX (keeps the grid axis parallel).
    return jnp.sum(partials[:, 0, 0])


def _reference(preds, labels, alpha=ALPHA, extrema_weight=EXTREMA_WEIGHT):
    # Pure-JAX reference of the PyTorch forward, for sanity checking.
    preds = preds.astype(jnp.float32)
    labels = labels.astype(jnp.float32)
    mse = jnp.mean((preds - labels) ** 2)
    dl = labels[:, 1:] - labels[:, :-1]
    dp = preds[:, 1:] - preds[:, :-1]
    inc = (dl > 0).astype(jnp.float32)
    dec = (dl < 0).astype(jnp.float32)
    mono = jnp.mean(inc * jnp.maximum(-dp, 0) + dec * jnp.maximum(dp, 0))
    es_m = (labels == jnp.float32(ES_SENTINEL)).astype(jnp.float32)
    es = jnp.mean((preds * es_m - labels * es_m) ** 2) * extrema_weight
    ed_m = (labels == jnp.float32(ED_SENTINEL)).astype(jnp.float32)
    ed = jnp.mean((preds * ed_m - labels * ed_m) ** 2) * extrema_weight
    return (1 - alpha) * mse + alpha * mono + es + ed


if __name__ == "__main__":
    key = jax.random.PRNGKey(0)

    # Test 1: small aligned (batch, seq) case, single block.
    kp, kl, key = jax.random.split(key, 3)
    B, T = 8, 128
    preds = jax.random.normal(kp, (B, T), dtype=jnp.float32)
    labels = jax.random.normal(kl, (B, T), dtype=jnp.float32)
    labels = labels.at[:, 0].set(jnp.float32(ES_SENTINEL))
    labels = labels.at[:, 5].set(jnp.float32(ED_SENTINEL))
    labels = labels.at[:, 64].set(jnp.float32(ES_SENTINEL))

    out = jax.block_until_ready(combine_loss(preds, labels))
    ref = _reference(preds, labels)
    assert jnp.allclose(out, ref, rtol=1e-5, atol=1e-5), (out, ref)

    # Test 2: ragged batch tiling (B=20, tile_rows=8 -> 3 blocks, masked tail)
    # exercises the multi-block parallel grid + row mask path.
    kp2, kl2 = jax.random.split(key)
    B2, T2 = 20, 128
    preds2 = jax.random.normal(kp2, (B2, T2), dtype=jnp.float32)
    labels2 = jax.random.normal(kl2, (B2, T2), dtype=jnp.float32)
    labels2 = labels2.at[:, 3].set(jnp.float32(ES_SENTINEL))
    labels2 = labels2.at[:, 100].set(jnp.float32(ED_SENTINEL))

    out2 = jax.block_until_ready(combine_loss(preds2, labels2, tile_rows=8))
    ref2 = _reference(preds2, labels2)
    assert jnp.allclose(out2, ref2, rtol=1e-5, atol=1e-5), (out2, ref2)

    print("KERNEL_OK")
</pallas_src>

<mosaic_0001>
module attributes {stable_mosaic.version = 11 : i64} {
  func.func @kernel(%arg0: i32, %arg1: memref<8x128xf32, #tpu.memory_space<vmem>>, %arg2: memref<8x128xf32, #tpu.memory_space<vmem>>, %arg3: memref<1x8x128xf32, #tpu.memory_space<vmem>>) attributes {dimension_semantics = [#tpu.dimension_semantics<parallel>], iteration_bounds = array<i64: 1>, scalar_prefetch = 0 : i64, scratch_operands = 0 : i64, tpu.core_type = #tpu.core_type<tc>, window_params = [{transform_indices = @transform_0, window_bounds = array<i64: 8, 128>}, {transform_indices = @transform_1, window_bounds = array<i64: 8, 128>}, {transform_indices = @transform_2, window_bounds = array<i64: 1, 8, 128>}]} {
    %c0 = arith.constant 0 : index
    %c0_0 = arith.constant 0 : index
    %0 = vector.load %arg1[%c0, %c0_0] : memref<8x128xf32, #tpu.memory_space<vmem>>, vector<8x128xf32>
    %c0_1 = arith.constant 0 : index
    %c0_2 = arith.constant 0 : index
    %1 = vector.load %arg2[%c0_1, %c0_2] : memref<8x128xf32, #tpu.memory_space<vmem>>, vector<8x128xf32>
    %2 = arith.subf %0, %1 : vector<8x128xf32>
    %3 = arith.mulf %2, %2 : vector<8x128xf32>
    %cst = arith.constant -2.000000e-01 : f32
    %4 = vector.broadcast %cst : f32 to vector<8x128xf32>
    %5 = arith.cmpf oeq, %1, %4 : vector<8x128xf32>
    %cst_3 = arith.constant 0.001953125 : f32
    %cst_4 = arith.constant 0.000000e+00 : f32
    %6 = vector.broadcast %cst_3 : f32 to vector<8x128xf32>
    %7 = vector.broadcast %cst_4 : f32 to vector<8x128xf32>
    %8 = arith.select %5, %6, %7 : vector<8x128xi1>, vector<8x128xf32>
    %cst_5 = arith.constant 1.200000e+00 : f32
    %9 = vector.broadcast %cst_5 : f32 to vector<8x128xf32>
    %10 = arith.cmpf oeq, %1, %9 : vector<8x128xf32>
    %cst_6 = arith.constant 0.001953125 : f32
    %cst_7 = arith.constant 0.000000e+00 : f32
    %11 = vector.broadcast %cst_6 : f32 to vector<8x128xf32>
    %12 = vector.broadcast %cst_7 : f32 to vector<8x128xf32>
    %13 = arith.select %10, %11, %12 : vector<8x128xi1>, vector<8x128xf32>
    %14 = arith.addf %8, %13 : vector<8x128xf32>
    %cst_8 = arith.constant 4.8828125E-4 : f32
    %15 = vector.broadcast %cst_8 : f32 to vector<8x128xf32>
    %16 = arith.addf %15, %14 : vector<8x128xf32>
    %17 = arith.mulf %16, %3 : vector<8x128xf32>
    %c127_i32 = arith.constant 127 : i32
    %18 = tpu.dynamic_rotate %1 by %c127_i32 dim 1 : vector<8x128xf32>, i32 -> vector<8x128xf32>
    %19 = arith.subf %18, %1 : vector<8x128xf32>
    %c127_i32_9 = arith.constant 127 : i32
    %20 = tpu.dynamic_rotate %0 by %c127_i32_9 dim 1 : vector<8x128xf32>, i32 -> vector<8x128xf32>
    %21 = arith.subf %20, %0 : vector<8x128xf32>
    %cst_10 = arith.constant 0.000000e+00 : f32
    %22 = vector.broadcast %cst_10 : f32 to vector<8x128xf32>
    %23 = arith.cmpf ogt, %19, %22 : vector<8x128xf32>
    %cst_11 = arith.constant 0.000000e+00 : f32
    %24 = vector.broadcast %cst_11 : f32 to vector<8x128xf32>
    %25 = arith.subf %24, %21 : vector<8x128xf32>
    %cst_12 = arith.constant 0.000000e+00 : f32
    %26 = vector.broadcast %cst_12 : f32 to vector<8x128xf32>
    %27 = arith.maximumf %25, %26 : vector<8x128xf32>
    %cst_13 = arith.constant 0.000000e+00 : f32
    %28 = vector.broadcast %cst_13 : f32 to vector<8x128xf32>
    %29 = arith.select %23, %27, %28 : vector<8x128xi1>, vector<8x128xf32>
    %cst_14 = arith.constant 0.000000e+00 : f32
    %30 = vector.broadcast %cst_14 : f32 to vector<8x128xf32>
    %31 = arith.cmpf olt, %19, %30 : vector<8x128xf32>
    %cst_15 = arith.constant 0.000000e+00 : f32
    %32 = vector.broadcast %cst_15 : f32 to vector<8x128xf32>
    %33 = arith.maximumf %21, %32 : vector<8x128xf32>
    %cst_16 = arith.constant 0.000000e+00 : f32
    %34 = vector.broadcast %cst_16 : f32 to vector<8x128xf32>
    %35 = arith.select %31, %33, %34 : vector<8x128xi1>, vector<8x128xf32>
    %36 = arith.addf %29, %35 : vector<8x128xf32>
    %37 = tpu.iota {dimensions = array<i32: 1>} : vector<8x128xi32>
    %c127_i32_17 = arith.constant 127 : i32
    %38 = vector.broadcast %c127_i32_17 : i32 to vector<8x128xi32>
    %39 = arith.cmpi slt, %37, %38 : vector<8x128xi32>
    %cst_18 = arith.constant 0.000000e+00 : f32
    %40 = vector.broadcast %cst_18 : f32 to vector<8x128xf32>
    %41 = arith.select %39, %36, %40 : vector<8x128xi1>, vector<8x128xf32>
    %cst_19 = arith.constant 4.921260e-04 : f32
    %42 = vector.broadcast %cst_19 : f32 to vector<8x128xf32>
    %43 = arith.mulf %42, %41 : vector<8x128xf32>
    %44 = arith.addf %17, %43 : vector<8x128xf32>
    %45 = vector.shape_cast %44 : vector<8x128xf32> to vector<1x8x128xf32>
    %cst_20 = arith.constant dense<0.000000e+00> : vector<1xf32>
    %46 = vector.multi_reduction <add>, %45, %cst_20 [1, 2] : vector<1x8x128xf32> to vector<1xf32>
    %47 = vector.shape_cast %46 : vector<1xf32> to vector<1x1x1xf32>
    %48 = vector.extract %47[0, 0, 0] : f32 from vector<1x1x1xf32>
    %49 = vector.broadcast %48 : f32 to vector<1x8x128xf32>
    %c0_21 = arith.constant 0 : index
    %c0_22 = arith.constant 0 : index
    %c0_23 = arith.constant 0 : index
    %50 = vector.load %arg3[%c0_21, %c0_22, %c0_23] : memref<1x8x128xf32, #tpu.memory_space<vmem>>, vector<1x8x128xf32>
    tpu.vector_store %arg3[%c0_21, %c0_22, %c0_23], %49 {strides = array<i32>} : memref<1x8x128xf32, #tpu.memory_space<vmem>>, vector<1x8x128xf32>,
    return
  }
  func.func @transform_0(%arg0: i32) -> (i32, i32) {
    %c0_i32 = arith.constant 0 : i32
    %c0_i32_0 = arith.constant 0 : i32
    return %arg0, %c0_i32 : i32, i32
  }
  func.func @transform_1(%arg0: i32) -> (i32, i32) {
    %c0_i32 = arith.constant 0 : i32
    %c0_i32_0 = arith.constant 0 : i32
    return %arg0, %c0_i32 : i32, i32
  }
  func.func @transform_2(%arg0: i32) -> (i32, i32, i32) {
    %c0_i32 = arith.constant 0 : i32
    %c0_i32_0 = arith.constant 0 : i32
    %c0_i32_1 = arith.constant 0 : i32
    return %arg0, %c0_i32, %c0_i32_0 : i32, i32, i32
  }
}

</mosaic_0001>

<bundles_post_ra>
// kernel: tpu_custom_call.1
= control target key start
LH: loop header
LB: loop body
LE: loop exit
PB: predicated region body
PF: predicated region fallthrough
CT: control target
= control target key end

     0   :  { %7 = vsyncpa [#allocation3], 0  ;;  %s229_s0 = inlined_call_operand.hbm [shape: f32[8,128], index: 0, kind: input, shape index: {}]   ;;  %s230_s1 = inlined_call_operand.hbm [shape: f32[8,128], index: 1, kind: input, shape index: {}]   ;;  %s231_s2 = inlined_call_operand.hbm [shape: f32[1,8,128], index: 2, kind: output, shape index: {}]  }
   0x1   :  { %8 = vsyncpa [#allocation6], 0 }
   0x2   :  { %9 = vsyncpa [#allocation4], 0  ;;  %s173_s9 = smov [#allocation2]   ;;  %s174_s11 = smov [#allocation5]  }
   0x3   :  { %s16_s10 = sshll.u32 %s173_s9, 4  ;;  %s26_s12 = sshll.u32 %s174_s11, 4  ;;  %s17_s10 = int_to_ptr.vmem [resolvable:$true] %s16_s10  ;;  %s27_s12 = int_to_ptr.vmem [resolvable:$true] %s26_s12 }
   0x4   :  { %s101_s15 = scalar_lea.hbm %s229_s0, 128 }
   0x5   :  { %p102_p0 = scmp.ne.s32.totalorder %s229_s0, %s101_s15  ;;  %p105_p1 = scmp.lt.u32.totalorder %s101_s15, %s229_s0 }
   0x7   :  { %p107_p2 = pnand %p105_p1, %p102_p0 }
   0x9   :  { %110 = shalt.err (!%p107_p2)
}
   0xa   :  { %s111_s20 = scalar_lea.vmem %s17_s10, 128  ;;  %p116_p4 = scmp.lt.s32.totalorder %s17_s10, %s17_s10 }
   0xb   :  { %p112_p3 = scmp.ne.s32.totalorder %s17_s10, %s111_s20  ;;  %p117_p5 = scmp.lt.s32.totalorder %s111_s20, %s111_s20 }
   0xd   :  { %p118_p6 = por %p117_p5, %p116_p4 }
   0xf   :  { %p119_p7 = pnand %p118_p6, %p112_p3 }
  0x11   :  { %122 = shalt.err (!%p119_p7)
}
  0x12   :  { %19 = dma.hbm_to_vmem [thread:$0]  %s229_s0, 128, %s17_s10, [#allocation3]  }
  0x13   :  { %s123_s25 = scalar_lea.hbm %s230_s1, 128 }
  0x14   :  { %p124_p8 = scmp.ne.s32.totalorder %s230_s1, %s123_s25  ;;  %p127_p9 = scmp.lt.u32.totalorder %s123_s25, %s230_s1 }
  0x16   :  { %p129_p10 = pnand %p127_p9, %p124_p8 }
  0x18   :  { %132 = shalt.err (!%p129_p10)
}
  0x19   :  { %s133_s30 = scalar_lea.vmem %s27_s12, 128  ;;  %p138_p12 = scmp.lt.s32.totalorder %s27_s12, %s27_s12 }
  0x1a   :  { %p134_p11 = scmp.ne.s32.totalorder %s27_s12, %s133_s30  ;;  %p139_p13 = scmp.lt.s32.totalorder %s133_s30, %s133_s30 }
  0x1c   :  { %p140_p0 = por %p139_p13, %p138_p12 }
  0x1e   :  { %p141_p1 = pnand %p140_p0, %p134_p11 }
  0x20   :  { %144 = shalt.err (!%p141_p1)
}
  0x21   :  { %29 = dma.hbm_to_vmem [thread:$0]  %s230_s1, 128, %s27_s12, [#allocation6]  }
  0x22   :  { %167 = dma.done.wait [#allocation3], 128  }
  0x23   :  { %168 = vsyncadd [#allocation3], 4294967168 }
  0x24   :  { %169 = dma.done.wait [#allocation6], 128  }
  0x25   :  { %170 = vsyncadd [#allocation6], 4294967168  ;;  %v36_v0 = vld [vmem:[#allocation2] sm:$0xff]  ;;  %s175_s4 = smov 127   ;;  %v37_v1 = vld [vmem:[#allocation5] sm:$0xff]  ;;  %v176_v2 = vmov 0.0   ;;  %v61_v6 = vlaneseq }
  0x26   :  { %50 = vrot.lane.b32.xlu0 %v36_v0, %s175_s4  ;;  %vm40_vm0 = vcmp.eq.f32.partialorder %v37_v1, -0.2  ;;  %vm42_vm1 = vcmp.eq.f32.partialorder %v37_v1, 1.2  ;;  %v38_v8 = vsub.f32 %v36_v0, %v37_v1  ;;  %s177_s1 = smov [#allocation7]  }
  0x27   :  { %v41_v3 = vsel %vm40_vm0, 0.001953125, %v176_v2  ;;  %v43_v4 = vsel %vm42_vm1, 0.001953125, %v176_v2  ;;  %v62_v12 = vand.u32 127, %v61_v6  ;;  %s84_s5 = sshll.u32 %s177_s1, 4  ;;  %s85_s5 = int_to_ptr.vmem [resolvable:$true] %s84_s5 }
  0x28   :  { %v44_v9 = vadd.f32 %v43_v4, %v41_v3  ;;  %v39_v16 = vmul.f32 %v38_v8, %v38_v8  ;;  %s145_s7 = scalar_lea.vmem %s85_s5, 128  ;;  %p150_p3 = scmp.lt.s32.totalorder %s85_s5, %s85_s5 }
  0x29   :  { %vm63_vm4 = vcmp.lt.s32.totalorder %v62_v12, 127  ;;  %p146_p2 = scmp.ne.s32.totalorder %s85_s5, %s145_s7  ;;  %p151_p4 = scmp.lt.s32.totalorder %s145_s7, %s145_s7 }
  0x2a   :  { %47 = vrot.lane.b32.xlu0 %v37_v1, %s175_s4  ;;  %v45_v17 = vadd.f32 0.00048828125, %v44_v9 }
  0x2b   :  { %p152_p5 = por %p151_p4, %p150_p3 }
  0x2c   :  { %v46_v21 = vmul.f32 %v45_v17, %v39_v16 }
  0x2d   :  { %p153_p6 = pnand %p152_p5, %p146_p2 }
  0x98   :  { %v51_v5 = vpop.permute.xlu0 %50 }
  0x99   :  { %v52_v7 = vsub.f32 %v51_v5, %v36_v0 }
  0x9b   :  { %v54_v10 = vsub.f32 0.0, %v52_v7  ;;  %v58_v15 = vmax.f32 %v52_v7, 0.0 }
  0x9c   :  { %v48_v11 = vpop.permute.xlu0 %47 }
  0x9d   :  { %v55_v13 = vmax.f32 %v54_v10, 0.0  ;;  %v49_v14 = vsub.f32 %v48_v11, %v37_v1 }
  0x9f   :  { %vm53_vm2 = vcmp.gt.f32.partialorder %v49_v14, 0.0  ;;  %vm57_vm3 = vcmp.lt.f32.partialorder %v49_v14, 0.0 }
  0xa0   :  { %v56_v18 = vsel %vm53_vm2, %v55_v13, 0.0  ;;  %v59_v19 = vsel %vm57_vm3, %v58_v15, 0.0 }
  0xa1   :  { %v60_v20 = vadd.f32 %v59_v19, %v56_v18 }
  0xa3   :  { %v64_v22 = vsel %vm63_vm4, %v60_v20, 0.0 }
  0xa4   :  { %v65_v23 = vmul.f32 0.000492126, %v64_v22 }
  0xa6   :  { %v66_v24 = vadd.f32 %v65_v23, %v46_v21 }
  0xa8   :  { %67 = vadd.xlane.f32.xlu1 %v66_v24 }
 0x135   :  { %v68_v25 = vpop.xlane.xlu1 %67 }
 0x136   :  { %v69_v26 = vrot.slane %v68_v25, 4 }
 0x138   :  { %v70_v27 = vadd.f32 %v69_v26, %v68_v25 }
 0x13a   :  { %v71_v28 = vrot.slane %v70_v27, 2 }
 0x13c   :  { %v72_v29 = vadd.f32 %v71_v28, %v70_v27 }
 0x13e   :  { %v73_v30 = vrot.slane %v72_v29, 1 }
 0x140   :  { %v74_v31 = vadd.f32 %v73_v30, %v72_v29 }
 0x142   :  { %94 = vpush %v74_v31 }
 0x173   :  { %s95_s6 = spop %94 }
 0x174   :  { %v76_v32 = vstv %s95_s6 }
 0x175   :  { %77 = vst [vmem:[#allocation7] sm:$0xff] %v76_v32 }
 0x176   :  { %156 = shalt.err (!%p153_p6)
}
 0x177   :  { %s157_s10 = scalar_lea.hbm %s231_s2, 128 }
 0x178   :  { %p158_p7 = scmp.ne.s32.totalorder %s231_s2, %s157_s10  ;;  %p161_p8 = scmp.lt.u32.totalorder %s157_s10, %s231_s2 }
 0x17a   :  { %p163_p9 = pnand %p161_p8, %p158_p7 }
 0x17c   :  { %166 = shalt.err (!%p163_p9)
}
 0x17d   :  { %87 = dma.vmem_to_hbm [thread:$0]  %s85_s5, 128, %s231_s2, [#allocation4]  }
 0x17e   :  { %171 = dma.done.wait [#allocation4], 128  }
 0x17f   :  { %172 = vsyncadd [#allocation4], 4294967168 }
 0x180   :  { %91 = vsyncpa [#allocation3], 1 }
 0x181   :  { %92 = vsyncpa [#allocation6], 1 }
 0x182   :  { %93 = vsyncpa [#allocation4], 1 }

</bundles_post_ra>
